<compile_context>
chip_gen: v7x
topology: tpu7x:2x2x1
jax: 0.10.0
libtpu: 0.0.40
codegen_flags: <defaults>
</compile_context>

<pallas_src>
import jax
import jax.numpy as jnp
from jax import lax
from jax.experimental import pallas as pl
from jax.experimental.pallas import tpu as pltpu


LANE = 128  # TPU lane width; channel / reduction dims are padded to multiples.


def _round_up(x, m):
    return (x + m - 1) // m * m


def _tpu_defaults():
    """Return (TILE_M cap, vmem_limit_bytes) for the current TPU generation."""
    try:
        kind = jax.devices()[0].device_kind.lower()
    except Exception:
        kind = ""
    if "v7" in kind:
        # 64 MiB VMEM per TensorCore -> stay well under it.
        return 512, 48 * 1024 * 1024
    if ("v5" in kind and ("lite" in kind or "v5e" in kind)) or "v6" in kind:
        # 128 MiB VMEM per core -> bigger tiles amortize per-step overhead.
        return 1024, 64 * 1024 * 1024
    # Conservative default for any other chip.
    return 512, 32 * 1024 * 1024


TILE_M_CAP, VMEM_LIMIT = _tpu_defaults()


# ----------------------------- Pallas kernels ------------------------------

def _conv_bn_relu_kernel(x_ref, w_ref, b_ref, o_ref):
    # (TILE_M, K) @ (K, C) on the MXU (bf16 in, f32 acc). BN scale is already
    # folded into w; only the bias add + ReLU remain on the VPU.
    acc = jnp.dot(x_ref[...], w_ref[...], preferred_element_type=jnp.float32)
    o_ref[...] = jnp.maximum(acc + b_ref[...], 0.0).astype(o_ref.dtype)


def _conv_bn_res_kernel(x_ref, w_ref, b_ref, r_ref, o_ref):
    # Second conv matmul, fused bias and fused identity residual add (bf16 in).
    acc = jnp.dot(x_ref[...], w_ref[...], preferred_element_type=jnp.float32)
    acc = acc + b_ref[...] + r_ref[...].astype(jnp.float32)
    o_ref[...] = acc.astype(o_ref.dtype)


def _conv_bn_proj_kernel(x_ref, w_ref, b_ref, xi_ref, wi_ref, o_ref):
    # Second conv matmul, fused bias and fused 1x1 projection shortcut
    # (second dot shares the same output tile / MXU).
    acc = jnp.dot(x_ref[...], w_ref[...], preferred_element_type=jnp.float32)
    acc = acc + b_ref[...]
    acc = acc + jnp.dot(xi_ref[...], wi_ref[...], preferred_element_type=jnp.float32)
    o_ref[...] = acc.astype(o_ref.dtype)


def _tiled_matmul_call(kernel, args, tile_m, m_pad, c_pad, out_dtype):
    """args: list of (array, tiled_along_M: bool) in kernel-argument order."""
    in_specs = []
    for arr, tiled in args:
        if tiled:
            in_specs.append(pl.BlockSpec((tile_m, arr.shape[1]), lambda i: (i, 0)))
        else:
            # Full-array block, constant index_map -> stays resident across M-tiles.
            in_specs.append(pl.BlockSpec(arr.shape, lambda i: (0, 0)))
    return pl.pallas_call(
        kernel,
        out_shape=jax.ShapeDtypeStruct((m_pad, c_pad), out_dtype),
        grid_spec=pltpu.PrefetchScalarGridSpec(
            num_scalar_prefetch=0,
            grid=(m_pad // tile_m,),
            in_specs=in_specs,
            out_specs=pl.BlockSpec((tile_m, c_pad), lambda i: (i, 0)),
        ),
        compiler_params=pltpu.CompilerParams(
            dimension_semantics=("parallel",),   # megacore sharding on v7x
            vmem_limit_bytes=VMEM_LIMIT,
        ),
    )(*[a for a, _ in args])


# ------------------------------ JAX glue ----------------------------------

def _im2col(x_nhwc, kh, kw, stride, pad):
    """x is NHWC bf16 with lane-padded channels C.

    Returns ((N*Ho*Wo, kh*kw*C) bf16 patches, Ho, Wo). Because C is already a
    multiple of 128, the K dim is lane-aligned with no extra pad pass.
    """
    N, H, W, C = x_nhwc.shape
    Ho = (H + 2 * pad - kh) // stride + 1
    Wo = (W + 2 * pad - kw) // stride + 1
    xp = jnp.pad(x_nhwc, ((0, 0), (pad, pad), (pad, pad), (0, 0)))
    cols = []
    for dh in range(kh):
        for dw in range(kw):
            cols.append(xp[:, dh:dh + stride * (Ho - 1) + 1:stride,
                              dw:dw + stride * (Wo - 1) + 1:stride, :])
    patches = jnp.concatenate(cols, axis=-1)
    return patches.reshape(N * Ho * Wo, kh * kw * C), Ho, Wo


def _prep_weight(w_oihw, scale, cin_pad, cout_pad):
    """(c_out, c_in, kh, kw) f32 -> (kh*kw*cin_pad, cout_pad) bf16.

    BN scale (if given) is folded into the output-channel columns in f32 before
    the bf16 cast; feature order matches _im2col: (dh, dw, c_in).
    """
    c_out, c_in, kh, kw = w_oihw.shape
    w = w_oihw * scale.reshape(-1, 1, 1, 1) if scale is not None else w_oihw
    w = jnp.pad(w, ((0, cout_pad - c_out), (0, cin_pad - c_in), (0, 0), (0, 0)))
    w = jnp.transpose(w, (2, 3, 1, 0)).reshape(kh * kw * cin_pad, cout_pad)
    return w.astype(jnp.bfloat16)


def _prep_bias(bias, cout_pad):
    return jnp.pad(bias.reshape(1, -1),
                   ((0, 0), (0, cout_pad - bias.shape[0]))).astype(jnp.float32)


def _pad_rows(a, m_pad):
    m = a.shape[0]
    return a if m == m_pad else jnp.pad(a, ((0, m_pad - m), (0, 0)))


def _fold_bn(p, eps=1e-5):
    scale = p["gamma"] / jnp.sqrt(p["var"] + eps)
    bias = p["beta"] - p["mean"] * scale
    return scale, bias


def resnet_block_forward(x_nchw, params, stride):
    """Pallas implementation of ResNetBlock.forward; x is NCHW, output is NCHW f32."""
    x = jnp.transpose(x_nchw, (0, 2, 3, 1))                     # NCHW -> NHWC
    N, H, W, c_in = x.shape
    w1 = params["w1"]
    c_out, _, k, _ = w1.shape

    scale1, bias1 = _fold_bn(params["bn1"])
    scale2, bias2 = _fold_bn(params["bn2"])

    cip = _round_up(c_in, LANE)
    cp = _round_up(c_out, LANE)

    # One cheap pass over the ORIGINAL input: bf16 cast + lane-pad channels.
    # Everything downstream (both im2cols, shortcut, kernels) stays bf16/aligned.
    xp = jnp.pad(x.astype(jnp.bfloat16),
                 ((0, 0), (0, 0), (0, 0), (0, cip - c_in)))

    # ---- conv1 + BN1 + ReLU ----
    p1, Ho, Wo = _im2col(xp, k, k, stride, 1)                   # (M, k*k*cip) bf16
    M = N * Ho * Wo
    tile_m = min(TILE_M_CAP, _round_up(M, LANE))
    mp = _round_up(M, tile_m)
    p1 = _pad_rows(p1, mp)
    h = _tiled_matmul_call(
        _conv_bn_relu_kernel,
        [(p1, True), (_prep_weight(w1, scale1, cip, cp), False),
         (_prep_bias(bias1, cp), False)],
        tile_m, mp, cp, jnp.bfloat16)                           # (mp, cp) bf16
    # Keep the lane-padded channels (they are exactly zero) so conv2's patches
    # are lane-aligned without another pad/cast pass.
    h = h[:M].reshape(N, Ho, Wo, cp)

    # ---- conv2 + BN2, with the shortcut fused into the same kernel ----
    p2, _, _ = _im2col(h, k, k, 1, 1)                           # (M, k*k*cp) bf16
    p2 = _pad_rows(p2, mp)
    w2f = _prep_weight(params["w2"], scale2, cp, cp)
    b2 = _prep_bias(bias2, cp)

    if params["wi"] is not None:
        # 1x1 conv shortcut (stride, pad 0): bf16 input, fused second dot.
        xi = _pad_rows(xp[:, ::stride, ::stride, :].reshape(M, cip), mp)
        wif = _prep_weight(params["wi"], None, cip, cp)
        out = _tiled_matmul_call(
            _conv_bn_proj_kernel,
            [(p2, True), (w2f, False), (b2, False), (xi, True), (wif, False)],
            tile_m, mp, cp, jnp.bfloat16)
    else:
        assert stride == 1 and c_in == c_out, (
            "identity shortcut requires stride == 1 and c_in == c_out")
        res = _pad_rows(xp.reshape(M, cip), mp)                 # bf16, cip == cp
        out = _tiled_matmul_call(
            _conv_bn_res_kernel,
            [(p2, True), (w2f, False), (b2, False), (res, True)],
            tile_m, mp, cp, jnp.bfloat16)

    out = out[:M, :c_out].reshape(N, Ho, Wo, c_out).astype(jnp.float32)
    return jnp.transpose(out, (0, 3, 1, 2))                     # -> NCHW


# --------------------------- Reference (pure JAX) ---------------------------

def _ref_forward(x, params, stride):
    def conv(x, w, s, pad):
        return lax.conv_general_dilated(
            x, w, (s, s), [(pad, pad), (pad, pad)],
            dimension_numbers=("NCHW", "OIHW", "NCHW"))

    def bn(x, p):
        scale = p["gamma"] / jnp.sqrt(p["var"] + 1e-5)
        bias = p["beta"] - p["mean"] * scale
        return x * scale.reshape(1, -1, 1, 1) + bias.reshape(1, -1, 1, 1)

    h = bn(conv(x, params["w1"], stride, 1), params["bn1"])
    h = jnp.maximum(h, 0.0)
    h = bn(conv(h, params["w2"], 1, 1), params["bn2"])
    i = conv(x, params["wi"], stride, 0) if params["wi"] is not None else x
    return h + i


# ------------------------------ Param setup --------------------------------

def init_params(key, c_in, c_out, k):
    ks = jax.random.split(key, 10)

    def bn_params(k0, k1, k2, k3, c):
        return {
            "gamma": 1.0 + 0.1 * jax.random.normal(k0, (c,), jnp.float32),
            "beta": 0.1 * jax.random.normal(k1, (c,), jnp.float32),
            "mean": 0.05 * jax.random.normal(k2, (c,), jnp.float32),
            "var": 1.0 + 0.1 * jax.random.uniform(k3, (c,), jnp.float32),
        }

    use_identity = c_in != c_out
    params = {
        "w1": 0.2 * jax.random.normal(ks[0], (c_out, c_in, k, k), jnp.float32),
        "w2": 0.2 * jax.random.normal(ks[1], (c_out, c_out, k, k), jnp.float32),
        "bn1": bn_params(ks[2], ks[3], ks[4], ks[5], c_out),
        "bn2": bn_params(ks[6], ks[7], ks[8], ks[9], c_out),
        "wi": (0.2 * jax.random.normal(jax.random.fold_in(key, 99),
                                       (c_out, c_in, 1, 1), jnp.float32)
               if use_identity else None),
    }
    return params


# --------------------------------- Main -------------------------------------

if __name__ == "__main__":
    key = jax.random.PRNGKey(0)
    kx, kp1, kp2 = jax.random.split(key, 3)

    # NOTE: demo shapes are tiny; tile_m / vmem limits are tuned for realistic
    # ResNet channel counts (64-512), where lane padding amortizes.

    # Case 1: c_in != c_out, stride 2 -> 1x1-conv shortcut fused into second kernel.
    x = jax.random.normal(kx, (2, 4, 16, 16), jnp.float32)
    params1 = init_params(kp1, c_in=4, c_out=8, k=3)
    out1 = resnet_block_forward(x, params1, stride=2)
    jax.block_until_ready(out1)
    ref1 = _ref_forward(x, params1, stride=2)
    assert out1.shape == (2, 8, 8, 8)
    assert jnp.allclose(out1, ref1, rtol=3e-2, atol=3e-2), (
        float(jnp.max(jnp.abs(out1 - ref1))))

    # Case 2: c_in == c_out, stride 1 -> plain identity shortcut fused as residual.
    params2 = init_params(kp2, c_in=4, c_out=4, k=3)
    out2 = resnet_block_forward(x, params2, stride=1)
    jax.block_until_ready(out2)
    ref2 = _ref_forward(x, params2, stride=1)
    assert out2.shape == (2, 4, 16, 16)
    assert jnp.allclose(out2, ref2, rtol=3e-2, atol=3e-2), (
        float(jnp.max(jnp.abs(out2 - ref2))))

    print("KERNEL_OK")
</pallas_src>

<mosaic_0001>
module attributes {stable_mosaic.version = 11 : i64} {
  func.func @_conv_bn_relu_kernel(%arg0: i32, %arg1: memref<128x1152xbf16, #tpu.memory_space<vmem>>, %arg2: memref<1152x128xbf16, #tpu.memory_space<vmem>>, %arg3: memref<1x128xf32, #tpu.memory_space<vmem>>, %arg4: memref<128x128xbf16, #tpu.memory_space<vmem>>) attributes {dimension_semantics = [#tpu.dimension_semantics<parallel>], iteration_bounds = array<i64: 1>, scalar_prefetch = 0 : i64, scratch_operands = 0 : i64, tpu.core_type = #tpu.core_type<tc>, window_params = [{transform_indices = @transform_0, window_bounds = array<i64: 128, 1152>}, {pipeline_mode = #tpu.pipeline_mode<synchronous>, transform_indices = @transform_1, window_bounds = array<i64: 1152, 128>}, {pipeline_mode = #tpu.pipeline_mode<synchronous>, transform_indices = @transform_2, window_bounds = array<i64: 1, 128>}, {transform_indices = @transform_3, window_bounds = array<i64: 128, 128>}]} {
    %c0 = arith.constant 0 : index
    %c0_0 = arith.constant 0 : index
    %0 = vector.load %arg1[%c0, %c0_0] : memref<128x1152xbf16, #tpu.memory_space<vmem>>, vector<128x1152xbf16>
    %c0_1 = arith.constant 0 : index
    %c0_2 = arith.constant 0 : index
    %1 = vector.load %arg2[%c0_1, %c0_2] : memref<1152x128xbf16, #tpu.memory_space<vmem>>, vector<1152x128xbf16>
    %cst = arith.constant dense<0.000000e+00> : vector<128x128xf32>
    %2 = tpu.matmul %0, %1, %cst {dimension_numbers = #tpu.dot_dimension_numbers<[1], [0], [0], [1], [0, 0, 1, 1], [], []>} : vector<128x1152xbf16>, vector<1152x128xbf16>, vector<128x128xf32> -> vector<128x128xf32>
    %c0_3 = arith.constant 0 : index
    %c0_4 = arith.constant 0 : index
    %3 = vector.load %arg3[%c0_3, %c0_4] : memref<1x128xf32, #tpu.memory_space<vmem>>, vector<1x128xf32>
    %4 = vector.broadcast %3 : vector<1x128xf32> to vector<128x128xf32>
    %5 = arith.addf %2, %4 : vector<128x128xf32>
    %cst_5 = arith.constant 0.000000e+00 : f32
    %6 = vector.broadcast %cst_5 : f32 to vector<128x128xf32>
    %7 = arith.maximumf %5, %6 : vector<128x128xf32>
    %8 = arith.truncf %7 : vector<128x128xf32> to vector<128x128xbf16>
    %c0_6 = arith.constant 0 : index
    %c0_7 = arith.constant 0 : index
    %9 = vector.load %arg4[%c0_6, %c0_7] : memref<128x128xbf16, #tpu.memory_space<vmem>>, vector<128x128xbf16>
    tpu.vector_store %arg4[%c0_6, %c0_7], %8 {strides = array<i32>} : memref<128x128xbf16, #tpu.memory_space<vmem>>, vector<128x128xbf16>,
    return
  }
  func.func @transform_0(%arg0: i32) -> (i32, i32) {
    %c0_i32 = arith.constant 0 : i32
    %c0_i32_0 = arith.constant 0 : i32
    return %arg0, %c0_i32 : i32, i32
  }
  func.func @transform_1(%arg0: i32) -> (i32, i32) {
    %c0_i32 = arith.constant 0 : i32
    %c0_i32_0 = arith.constant 0 : i32
    %c0_i32_1 = arith.constant 0 : i32
    return %c0_i32, %c0_i32_0 : i32, i32
  }
  func.func @transform_2(%arg0: i32) -> (i32, i32) {
    %c0_i32 = arith.constant 0 : i32
    %c0_i32_0 = arith.constant 0 : i32
    %c0_i32_1 = arith.constant 0 : i32
    return %c0_i32, %c0_i32_0 : i32, i32
  }
  func.func @transform_3(%arg0: i32) -> (i32, i32) {
    %c0_i32 = arith.constant 0 : i32
    %c0_i32_0 = arith.constant 0 : i32
    return %arg0, %c0_i32 : i32, i32
  }
}

</mosaic_0001>

<bundles_post_ra>
// kernel: tpu_custom_call.1
= control target key start
LH: loop header
LB: loop body
LE: loop exit
PB: predicated region body
PF: predicated region fallthrough
CT: control target
= control target key end

     0   :  { %8 = vsyncpa [#allocation3], 0  ;;  %s2641_s0 = inlined_call_operand.hbm [shape: bf16[128,1152], index: 0, kind: input, shape index: {}]   ;;  %s2642_s1 = inlined_call_operand.hbm [shape: bf16[1152,128], index: 1, kind: input, shape index: {}]   ;;  %s2643_s2 = inlined_call_operand.vmem [shape: f32[1,128], index: 2, kind: input, shape index: {}]   ;;  %s2644_s3 = inlined_call_operand.hbm [shape: bf16[128,128], index: 3, kind: output, shape index: {}]  }
   0x1   :  { %9 = vsyncpa [#allocation6], 0 }
   0x2   :  { %10 = vsyncpa [#allocation4], 0  ;;  %s2473_s12 = smov [#allocation2]   ;;  %s2401_s16 = scalar_lea.hbm %s2641_s0, 9216 }
   0x3   :  { %s16_s13 = sshll.u32 %s2473_s12, 4  ;;  %p2402_p0 = scmp.ne.s32.totalorder %s2641_s0, %s2401_s16  ;;  %s17_s13 = int_to_ptr.vmem [resolvable:$true] %s16_s13 }
   0x4   :  { %p2405_p1 = scmp.lt.u32.totalorder %s2401_s16, %s2641_s0 }
   0x6   :  { %p2407_p2 = pnand %p2405_p1, %p2402_p0 }
   0x8   :  { %2410 = shalt.err (!%p2407_p2)
}
   0x9   :  { %s2411_s21 = scalar_lea.vmem %s17_s13, 9216  ;;  %p2416_p4 = scmp.lt.s32.totalorder %s17_s13, %s17_s13 }
   0xa   :  { %p2412_p3 = scmp.ne.s32.totalorder %s17_s13, %s2411_s21  ;;  %p2417_p5 = scmp.lt.s32.totalorder %s2411_s21, %s2411_s21 }
   0xc   :  { %p2418_p6 = por %p2417_p5, %p2416_p4 }
   0xe   :  { %p2419_p7 = pnand %p2418_p6, %p2412_p3 }
  0x10   :  { %2422 = shalt.err (!%p2419_p7)
}
  0x11   :  { %s2474_s22 = smov 576   ;;  %s2475_s23 = smov 36  }
  0x12   :  { %22 = dma.hbm_to_vmem [thread:$0]  %s2641_s0, 9216, %s17_s13, [#allocation3], %s2474_s22, %s2474_s22, %s2475_s23  }
  0x13   :  { %s2476_s26 = smov [#allocation5]   ;;  %s2423_s30 = scalar_lea.hbm %s2642_s1, 9216 }
  0x14   :  { %s28_s27 = sshll.u32 %s2476_s26, 4  ;;  %p2424_p8 = scmp.ne.s32.totalorder %s2642_s1, %s2423_s30  ;;  %s29_s27 = int_to_ptr.vmem [resolvable:$true] %s28_s27 }
  0x15   :  { %p2427_p9 = scmp.lt.u32.totalorder %s2423_s30, %s2642_s1 }
  0x17   :  { %p2429_p10 = pnand %p2427_p9, %p2424_p8 }
  0x19   :  { %2432 = shalt.err (!%p2429_p10)
}
  0x1a   :  { %s2433_s8 = scalar_lea.vmem %s29_s27, 9216  ;;  %p2438_p12 = scmp.lt.s32.totalorder %s29_s27, %s29_s27 }
  0x1b   :  { %p2434_p11 = scmp.ne.s32.totalorder %s29_s27, %s2433_s8  ;;  %p2439_p13 = scmp.lt.s32.totalorder %s2433_s8, %s2433_s8 }
  0x1d   :  { %p2440_p0 = por %p2439_p13, %p2438_p12 }
  0x1f   :  { %p2441_p1 = pnand %p2440_p0, %p2434_p11 }
  0x21   :  { %2444 = shalt.err (!%p2441_p1)
}
  0x22   :  { %s2477_s0 = smov 64   ;;  %s2478_s9 = smov 4  }
  0x23   :  { %34 = dma.hbm_to_vmem [thread:$0]  %s2642_s1, 9216, %s29_s27, [#allocation6], %s2477_s0, %s2477_s0, %s2478_s9  }
  0x24   :  { %2467 = dma.done.wait [#allocation3], 9216  }
  0x25   :  { %2468 = vsyncadd [#allocation3], 4294958080 }
  0x26   :  { %2469 = dma.done.wait [#allocation6], 9216  }
  0x27   :  { %2470 = vsyncadd [#allocation6], 4294958080  ;;  %v2225_v0 = vld [vmem:[#allocation5 + $0x40] sm:$0xff]   ;;  %v2229_v4 = vld [vmem:[#allocation5 + $0x48] sm:$0xff]  }
  0x28   :  { %v2226_v1 = vld [vmem:[#allocation5 + $0xc0] sm:$0xff]   ;;  %1898 = vmatprep.subr.bf16.mxu0 %v2225_v0  ;;  %v2230_v5 = vld [vmem:[#allocation5 + $0xc8] sm:$0xff]   ;;  %v2233_v8 = vld [vmem:[#allocation5 + $0x50] sm:$0xff]  }
  0x29   :  { %v2227_v2 = vld [vmem:[#allocation5] sm:$0xff]   ;;  %1962 = vmatprep.subr.bf16.mxu1 %v2226_v1  ;;  %v2231_v6 = vld [vmem:[#allocation5 + $0x8] sm:$0xff]   ;;  %v2234_v9 = vld [vmem:[#allocation5 + $0xd0] sm:$0xff]  }
  0x2a   :  { %v2228_v3 = vld [vmem:[#allocation5 + $0x80] sm:$0xff]   ;;  %1899 = vmatpush3.bf16.msra.mxu0 %v2227_v2  ;;  %v2232_v7 = vld [vmem:[#allocation5 + $0x88] sm:$0xff]   ;;  %v2235_v10 = vld [vmem:[#allocation5 + $0x10] sm:$0xff]  }
  0x2b   :  { %1963 = vmatpush3.bf16.msra.mxu1 %v2228_v3  ;;  %1900 = vmatprep.subr.bf16.mxu0 %v2229_v4  ;;  %v2236_v11 = vld [vmem:[#allocation5 + $0x90] sm:$0xff]   ;;  %v2237_v12 = vld [vmem:[#allocation5 + $0x58] sm:$0xff]   ;;  %v2241_v16 = vld [vmem:[#allocation5 + $0x60] sm:$0xff]  }
  0x2c   :  { %1964 = vmatprep.subr.bf16.mxu1 %v2230_v5  ;;  %v2238_v13 = vld [vmem:[#allocation5 + $0xd8] sm:$0xff]   ;;  %v2242_v17 = vld [vmem:[#allocation5 + $0xe0] sm:$0xff]   ;;  %v2245_v20 = vld [vmem:[#allocation5 + $0x68] sm:$0xff]  }
  0x2d   :  { %v2239_v14 = vld [vmem:[#allocation5 + $0x18] sm:$0xff]   ;;  %v2243_v18 = vld [vmem:[#allocation5 + $0x20] sm:$0xff]   ;;  %v2246_v21 = vld [vmem:[#allocation5 + $0xe8] sm:$0xff]  }
  0x2e   :  { %1901 = vmatpush3.bf16.msra.mxu0 %v2231_v6  ;;  %v2240_v15 = vld [vmem:[#allocation5 + $0x98] sm:$0xff]   ;;  %v2244_v19 = vld [vmem:[#allocation5 + $0xa0] sm:$0xff]   ;;  %v2247_v22 = vld [vmem:[#allocation5 + $0x28] sm:$0xff]  }
  0x2f   :  { %1965 = vmatpush3.bf16.msra.mxu1 %v2232_v7  ;;  %1902 = vmatprep.subr.bf16.mxu0 %v2233_v8  ;;  %v2248_v23 = vld [vmem:[#allocation5 + $0xa8] sm:$0xff]   ;;  %v2249_v24 = vld [vmem:[#allocation5 + $0x70] sm:$0xff]   ;;  %v2253_v28 = vld [vmem:[#allocation5 + $0x78] sm:$0xff]  }
  0x30   :  { %1966 = vmatprep.subr.bf16.mxu1 %v2234_v9  ;;  %v2250_v25 = vld [vmem:[#allocation5 + $0xf0] sm:$0xff]   ;;  %v2254_v29 = vld [vmem:[#allocation5 + $0xf8] sm:$0xff]   ;;  %v2257_v32 = vld [vmem:[#allocation2] ss:$36 sps:$4 sm:$0xff]  }
  0x31   :  { %v2251_v26 = vld [vmem:[#allocation5 + $0x30] sm:$0xff]   ;;  %v2255_v30 = vld [vmem:[#allocation5 + $0x38] sm:$0xff]   ;;  %v2259_v33 = vld [vmem:[#allocation2 + $0x4] ss:$36 sps:$4 sm:$0xff]  }
  0x32   :  { %1903 = vmatpush3.bf16.msra.mxu0 %v2235_v10  ;;  %v2252_v27 = vld [vmem:[#allocation5 + $0xb0] sm:$0xff]   ;;  %v2256_v31 = vld [vmem:[#allocation5 + $0xb8] sm:$0xff]   ;;  %v2260_v34 = vld [vmem:[#allocation2 + $0x8] ss:$36 sps:$4 sm:$0xff]   ;;  %1107 = vmatprep.mubr.bf16.mxu0 %v2259_v33 }
  0x33   :  { %1967 = vmatpush3.bf16.msra.mxu1 %v2236_v11  ;;  %1904 = vmatprep.subr.bf16.mxu0 %v2237_v12  ;;  %v2262_v35 = vld [vmem:[#allocation2 + $0xc] ss:$36 sps:$4 sm:$0xff]   ;;  %v2263_v36 = vld [vmem:[#allocation5 + $0x140] sm:$0xff]   ;;  %v2269_v41 = vld [vmem:[#allocation2 + $0x54] ss:$36 sps:$4 sm:$0xff]  }
  0x34   :  { %1968 = vmatprep.subr.bf16.mxu1 %v2238_v13  ;;  %1204 = vmatprep.mubr.bf16.mxu1 %v2262_v35  ;;  %v2264_v37 = vld [vmem:[#allocation5 + $0x1c0] sm:$0xff]   ;;  %v2267_v40 = vld [vmem:[#allocation2 + $0x4c] ss:$36 sps:$4 sm:$0xff]   ;;  %v2277_v48 = vld [vmem:[#allocation2 + $0x94] ss:$36 sps:$4 sm:$0xff]  }
  0x35   :  { %v2265_v38 = vld [vmem:[#allocation5 + $0x100] sm:$0xff]   ;;  %v2271_v42 = vld [vmem:[#allocation2 + $0x48] ss:$36 sps:$4 sm:$0xff]   ;;  %v2272_v43 = vld [vmem:[#allocation2 + $0x50] ss:$36 sps:$4 sm:$0xff]  }
  0x36   :  { %1905 = vmatpush3.bf16.msra.mxu0 %v2239_v14  ;;  %v2266_v39 = vld [vmem:[#allocation5 + $0x180] sm:$0xff]   ;;  %v2273_v44 = vld [vmem:[#allocation5 + $0x148] sm:$0xff]   ;;  %v2281_v50 = vld [vmem:[#allocation2 + $0x90] ss:$36 sps:$4 sm:$0xff]  }
  0x37   :  { %1969 = vmatpush3.bf16.msra.mxu1 %v2240_v15  ;;  %1906 = vmatprep.subr.bf16.mxu0 %v2241_v16  ;;  %v2274_v45 = vld [vmem:[#allocation5 + $0x1c8] sm:$0xff]   ;;  %v2279_v49 = vld [vmem:[#allocation2 + $0x9c] ss:$36 sps:$4 sm:$0xff]   ;;  %v2283_v52 = vld [vmem:[#allocation5 + $0x150] sm:$0xff]  }
  0x38   :  { %1970 = vmatprep.subr.bf16.mxu1 %v2242_v17  ;;  %v2275_v46 = vld [vmem:[#allocation5 + $0x108] sm:$0xff]   ;;  %v2282_v51 = vld [vmem:[#allocation2 + $0x98] ss:$36 sps:$4 sm:$0xff]   ;;  %v2284_v53 = vld [vmem:[#allocation5 + $0x1d0] sm:$0xff]  }
  0x39   :  { %v2276_v47 = vld [vmem:[#allocation5 + $0x188] sm:$0xff]   ;;  %v2285_v54 = vld [vmem:[#allocation5 + $0x110] sm:$0xff]   ;;  %v2287_v56 = vld [vmem:[#allocation2 + $0xdc] ss:$36 sps:$4 sm:$0xff]  }
  0x3a   :  { %1907 = vmatpush3.bf16.msra.mxu0 %v2243_v18  ;;  %v2286_v55 = vld [vmem:[#allocation5 + $0x190] sm:$0xff]   ;;  %v2289_v57 = vld [vmem:[#allocation2 + $0xe4] ss:$36 sps:$4 sm:$0xff]   ;;  %v2291_v58 = vld [vmem:[#allocation2 + $0xd8] ss:$36 sps:$4 sm:$0xff]  }
  0x3b   :  { %1971 = vmatpush3.bf16.msra.mxu1 %v2244_v19  ;;  %1908 = vmatprep.subr.bf16.mxu0 %v2245_v20  ;;  %v2292_v59 = vld [vmem:[#allocation2 + $0xe0] ss:$36 sps:$4 sm:$0xff]   ;;  %v2293_v60 = vld [vmem:[#allocation5 + $0x158] sm:$0xff]   ;;  %v2299_v1 = vld [vmem:[#allocation2 + $0x12c] ss:$36 sps:$4 sm:$0xff]  }
  0x3c   :  { %1972 = vmatprep.subr.bf16.mxu1 %v2246_v21  ;;  %v2294_v61 = vld [vmem:[#allocation5 + $0x1d8] sm:$0xff]   ;;  %v2297_v0 = vld [vmem:[#allocation2 + $0x124] ss:$36 sps:$4 sm:$0xff]   ;;  %v2307_v8 = vld [vmem:[#allocation2 + $0x16c] ss:$36 sps:$4 sm:$0xff]  }
  0x3d   :  { %v2295_v62 = vld [vmem:[#allocation5 + $0x118] sm:$0xff]   ;;  %v2301_v2 = vld [vmem:[#allocation2 + $0x120] ss:$36 sps:$4 sm:$0xff]   ;;  %v2302_v4 = vld [vmem:[#allocation2 + $0x128] ss:$36 sps:$4 sm:$0xff]  }
  0x3e   :  { %1909 = vmatpush3.bf16.msra.mxu0 %v2247_v22  ;;  %v2296_v63 = vld [vmem:[#allocation5 + $0x198] sm:$0xff]   ;;  %v2303_v3 = vld [vmem:[#allocation5 + $0x160] sm:$0xff]   ;;  %v2313_v10 = vld [vmem:[#allocation5 + $0x168] sm:$0xff]  }
  0x3f   :  { %1973 = vmatpush3.bf16.msra.mxu1 %v2248_v23  ;;  %1910 = vmatprep.subr.bf16.mxu0 %v2249_v24  ;;  %v2304_v5 = vld [vmem:[#allocation5 + $0x1e0] sm:$0xff]   ;;  %v2309_v9 = vld [vmem:[#allocation2 + $0x174] ss:$36 sps:$4 sm:$0xff]   ;;  %v2314_v11 = vld [vmem:[#allocation5 + $0x1e8] sm:$0xff]  }
  0x40   :  { %1974 = vmatprep.subr.bf16.mxu1 %v2250_v25  ;;  %v2305_v6 = vld [vmem:[#allocation5 + $0x120] sm:$0xff]   ;;  %v2311_v12 = vld [vmem:[#allocation2 + $0x168] ss:$36 sps:$4 sm:$0xff]   ;;  %v2312_v15 = vld [vmem:[#allocation2 + $0x170] ss:$36 sps:$4 sm:$0xff]  }
  0x41   :  { %v2306_v7 = vld [vmem:[#allocation5 + $0x1a0] sm:$0xff]   ;;  %v2315_v13 = vld [vmem:[#allocation5 + $0x128] sm:$0xff]   ;;  %v2317_v16 = vld [vmem:[#allocation2 + $0x1b4] ss:$36 sps:$4 sm:$0xff]  }
  0x42   :  { %1911 = vmatpush3.bf16.msra.mxu0 %v2251_v26  ;;  %v2316_v14 = vld [vmem:[#allocation5 + $0x1a8] sm:$0xff]   ;;  %v2319_v17 = vld [vmem:[#allocation2 + $0x1bc] ss:$36 sps:$4 sm:$0xff]   ;;  %v2323_v18 = vld [vmem:[#allocation5 + $0x170] sm:$0xff]  }
  0x43   :  { %1975 = vmatpush3.bf16.msra.mxu1 %v2252_v27  ;;  %1912 = vmatprep.subr.bf16.mxu0 %v2253_v28  ;;  %v2324_v19 = vld [vmem:[#allocation5 + $0x1f0] sm:$0xff]   ;;  %v2322_v23 = vld [vmem:[#allocation2 + $0x1b8] ss:$36 sps:$4 sm:$0xff]   ;;  %v2329_v25 = vld [vmem:[#allocation2 + $0x204] ss:$36 sps:$4 sm:$0xff]  }
  0x44   :  { %1976 = vmatprep.subr.bf16.mxu1 %v2254_v29  ;;  %v2325_v20 = vld [vmem:[#allocation5 + $0x130] sm:$0xff]   ;;  %v2327_v24 = vld [vmem:[#allocation2 + $0x1fc] ss:$36 sps:$4 sm:$0xff]  }
  0x45   :  { %v2326_v21 = vld [vmem:[#allocation5 + $0x1b0] sm:$0xff]   ;;  %v2333_v26 = vld [vmem:[#allocation5 + $0x178] sm:$0xff]  }
  0x46   :  { %1913 = vmatpush3.bf16.msra.mxu0 %v2255_v30  ;;  %v2321_v22 = vld [vmem:[#allocation2 + $0x1b0] ss:$36 sps:$4 sm:$0xff]   ;;  %v2334_v27 = vld [vmem:[#allocation5 + $0x1f8] sm:$0xff]  }
  0x47   :  { %1977 = vmatpush3.bf16.msra.mxu1 %v2256_v31  ;;  %2026 = vmatprep.subr.bf16.mxu0 %v2263_v36  ;;  %v2335_v28 = vld [vmem:[#allocation5 + $0x138] sm:$0xff]   ;;  %v2332_v31 = vld [vmem:[#allocation2 + $0x200] ss:$36 sps:$4 sm:$0xff]   ;;  %v2337_v35 = vld [vmem:[#allocation2 + $0x10] ss:$36 sps:$4 sm:$0xff]  }
  0x48   :  { %2090 = vmatprep.subr.bf16.mxu1 %v2264_v37  ;;  %v2336_v29 = vld [vmem:[#allocation5 + $0x1b8] sm:$0xff]  }
  0x49   :  { %1108 = vmatmul.mubr.bf16.vlgmr.msra.gmra.mrb[0].mxu0 %v2257_v32  ;;  %v2331_v30 = vld [vmem:[#allocation2 + $0x1f8] ss:$36 sps:$4 sm:$0xff]   ;;  %v2343_v32 = vld [vmem:[#allocation5 + $0x200] sm:$0xff]  }
  0x4a   :  { %1205 = vmatmul.mubr.bf16.vlgmr.msra.gmra.mrb[0].mxu1 %v2260_v34  ;;  %2027 = vmatpush3.bf16.msra.mxu0 %v2265_v38  ;;  %v2339_v33 = vld [vmem:[#allocation2 + $0x14] ss:$36 sps:$4 sm:$0xff]   ;;  %v2342_v34 = vld [vmem:[#allocation2 + $0x1c] ss:$36 sps:$4 sm:$0xff]   ;;  %v2346_v38 = vld [vmem:[#allocation2 + $0x64] ss:$36 sps:$4 sm:$0xff]  }
  0x4b   :  { %2091 = vmatpush3.bf16.msra.mxu1 %v2266_v39  ;;  %1115 = vmatprep.mubr.bf16.mxu0 %v2267_v40  ;;  %v2340_v36 = vld [vmem:[#allocation2 + $0x18] ss:$36 sps:$4 sm:$0xff]   ;;  %v2350_v39 = vld [vmem:[#allocation5 + $0x208] sm:$0xff]   ;;  %v2357_v40 = vld [vmem:[#allocation5 + $0x210] sm:$0xff]  }
  0x4c   :  { %1212 = vmatprep.mubr.bf16.mxu1 %v2269_v41  ;;  %2028 = vmatprep.subr.bf16.mxu0 %v2273_v44  ;;  %v2344_v37 = vld [vmem:[#allocation2 + $0x5c] ss:$36 sps:$4 sm:$0xff]   ;;  %v2353_v44 = vld [vmem:[#allocation2 + $0xac] ss:$36 sps:$4 sm:$0xff]  }
  0x4d   :  { %2092 = vmatprep.subr.bf16.mxu1 %v2274_v45  ;;  %v2348_v41 = vld [vmem:[#allocation2 + $0x58] ss:$36 sps:$4 sm:$0xff]  }
  0x4e   :  { %2029 = vmatpush3.bf16.msra.mxu0 %v2275_v46  ;;  %v2364_v45 = vld [vmem:[#allocation5 + $0x218] sm:$0xff]   ;;  %v2371_v46 = vld [vmem:[#allocation5 + $0x220] sm:$0xff]  }
  0x4f   :  { %2093 = vmatpush3.bf16.msra.mxu1 %v2276_v47  ;;  %2030 = vmatprep.subr.bf16.mxu0 %v2283_v52  ;;  %v2355_v47 = vld [vmem:[#allocation2 + $0xa0] ss:$36 sps:$4 sm:$0xff]   ;;  %v2362_v52 = vld [vmem:[#allocation2 + $0xe8] ss:$36 sps:$4 sm:$0xff]  }
  0x50   :  { %2094 = vmatprep.subr.bf16.mxu1 %v2284_v53  ;;  %v2385_v53 = vld [vmem:[#allocation5 + $0x230] sm:$0xff]  }
  0x51   :  { %1116 = vmatmul.mubr.bf16.gmra.mrb[4].mxu0 %v2271_v42  ;;  %v2349_v42 = vld [vmem:[#allocation2 + $0x60] ss:$36 sps:$4 sm:$0xff]  }
  0x52   :  { %1213 = vmatmul.mubr.bf16.gmra.mrb[4].mxu1 %v2272_v43  ;;  %1123 = vmatprep.mubr.bf16.mxu0 %v2277_v48  ;;  %v2351_v43 = vld [vmem:[#allocation2 + $0xa4] ss:$36 sps:$4 sm:$0xff]  }
  0x53   :  { %1220 = vmatprep.mubr.bf16.mxu1 %v2279_v49  ;;  %2031 = vmatpush3.bf16.msra.mxu0 %v2285_v54  ;;  %v2356_v48 = vld [vmem:[#allocation2 + $0xa8] ss:$36 sps:$4 sm:$0xff]   ;;  %v2363_v54 = vld [vmem:[#allocation2 + $0xf0] ss:$36 sps:$4 sm:$0xff]  }
  0x54   :  { %2095 = vmatpush3.bf16.msra.mxu1 %v2286_v55  ;;  %2032 = vmatprep.subr.bf16.mxu0 %v2293_v60  ;;  %v2358_v49 = vld [vmem:[#allocation2 + $0xec] ss:$36 sps:$4 sm:$0xff]   ;;  %v2365_v55 = vld [vmem:[#allocation2 + $0x134] ss:$36 sps:$4 sm:$0xff]   ;;  %v2372_v60 = vld [vmem:[#allocation2 + $0x17c] ss:$36 sps:$4 sm:$0xff]  }
  0x55   :  { %2096 = vmatprep.subr.bf16.mxu1 %v2294_v61  ;;  %v2374_v61 = vld [vmem:[#allocation2 + $0x184] ss:$36 sps:$4 sm:$0xff]  }
  0x57   :  { %2033 = vmatpush3.bf16.msra.mxu0 %v2295_v62  ;;  %v2376_v62 = vld [vmem:[#allocation2 + $0x178] ss:$36 sps:$4 sm:$0xff]  }
  0x58   :  { %2097 = vmatpush3.bf16.msra.mxu1 %v2296_v63  ;;  %2034 = vmatprep.subr.bf16.mxu0 %v2303_v3  ;;  %v2377_v63 = vld [vmem:[#allocation2 + $0x180] ss:$36 sps:$4 sm:$0xff]   ;;  %v2384_v3 = vld [vmem:[#allocation2 + $0x1c8] ss:$36 sps:$4 sm:$0xff]  }
  0x59   :  { %1124 = vmatmul.mubr.bf16.gmra.mrb[8].mxu0 %v2281_v50  ;;  %2098 = vmatprep.subr.bf16.mxu1 %v2304_v5  ;;  %v2360_v50 = vld [vmem:[#allocation2 + $0xf4] ss:$36 sps:$4 sm:$0xff]  }
  0x5a   :  { %1221 = vmatmul.mubr.bf16.gmra.mrb[8].mxu1 %v2282_v51  ;;  %1131 = vmatprep.mubr.bf16.mxu0 %v2287_v56  ;;  %v2378_v51 = vld [vmem:[#allocation5 + $0x228] sm:$0xff]   ;;  %v2367_v56 = vld [vmem:[#allocation2 + $0x13c] ss:$36 sps:$4 sm:$0xff]   ;;  %v2388_v5 = vld [vmem:[#allocation2 + $0x214] ss:$36 sps:$4 sm:$0xff]  }
  0x5b   :  { %1228 = vmatprep.mubr.bf16.mxu1 %v2289_v57  ;;  %2035 = vmatpush3.bf16.msra.mxu0 %v2305_v6  ;;  %v2392_v57 = vld [vmem:[#allocation5 + $0x238] sm:$0xff]   ;;  %v2390_v6 = vld [vmem:[#allocation2 + $0x208] ss:$36 sps:$4 sm:$0xff]  }
  0x5c   :  { %2099 = vmatpush3.bf16.msra.mxu1 %v2306_v7  ;;  %2036 = vmatprep.subr.bf16.mxu0 %v2313_v10  ;;  %v2391_v7 = vld [vmem:[#allocation2 + $0x210] ss:$36 sps:$4 sm:$0xff]   ;;  %v2395_v10 = vld [vmem:[#allocation2 + $0x68] ss:$36 sps:$4 sm:$0xff]  }
  0x5d   :  { %2100 = vmatprep.subr.bf16.mxu1 %v2314_v11  ;;  %v2396_v11 = vld [vmem:[#allocation2 + $0x188] ss:$36 sps:$4 sm:$0xff]  }
  0x5f   :  { %2037 = vmatpush3.bf16.msra.mxu0 %v2315_v13  ;;  %v2398_v13 = vld [vmem:[#allocation2 + $0x1d0] ss:$36 sps:$4 sm:$0xff]  }
  0x60   :  { %2101 = vmatpush3.bf16.msra.mxu1 %v2316_v14  ;;  %2038 = vmatprep.subr.bf16.mxu0 %v2323_v18  ;;  %v2399_v14 = vld [vmem:[#allocation2 + $0xf8] ss:$36 sps:$4 sm:$0xff]   ;;  %v2530_v18 = vld [vmem:[%s2643_s2] ss:$0 sm:$0xff]  ;;  %s2479_s2 = smov [#allocation7]  }
  0x61   :  { %1132 = vmatmul.mubr.bf16.gmra.mrb[12].mxu0 %v2291_v58  ;;  %2102 = vmatprep.subr.bf16.mxu1 %v2324_v19  ;;  %v2369_v58 = vld [vmem:[#allocation2 + $0x130] ss:$36 sps:$4 sm:$0xff]   ;;  %s1661_s13 = sshll.u32 %s2479_s2, 4  ;;  %s1662_s13 = int_to_ptr.vmem [resolvable:$true] %s1661_s13 }
  0x62   :  { %1229 = vmatmul.mubr.bf16.gmra.mrb[12].mxu1 %v2292_v59  ;;  %1139 = vmatprep.mubr.bf16.mxu0 %v2297_v0  ;;  %v2370_v59 = vld [vmem:[#allocation2 + $0x138] ss:$36 sps:$4 sm:$0xff]   ;;  %v2379_v0 = vld [vmem:[#allocation2 + $0x1c4] ss:$36 sps:$4 sm:$0xff]   ;;  %s2445_s14 = scalar_lea.vmem %s1662_s13, 1024  ;;  %p2450_p3 = scmp.lt.s32.totalorder %s1662_s13, %s1662_s13 }
  0x63   :  { %1236 = vmatprep.mubr.bf16.mxu1 %v2299_v1  ;;  %2039 = vmatpush3.bf16.msra.mxu0 %v2325_v20  ;;  %v2381_v1 = vld [vmem:[#allocation2 + $0x1cc] ss:$36 sps:$4 sm:$0xff]   ;;  %p2446_p2 = scmp.ne.s32.totalorder %s1662_s13, %s2445_s14  ;;  %p2451_p4 = scmp.lt.s32.totalorder %s2445_s14, %s2445_s14 }
  0x64   :  { %2103 = vmatpush3.bf16.msra.mxu1 %v2326_v21  ;;  %2040 = vmatprep.subr.bf16.mxu0 %v2333_v26 }
  0x65   :  { %2104 = vmatprep.subr.bf16.mxu1 %v2334_v27  ;;  %p2452_p5 = por %p2451_p4, %p2450_p3 }
  0x67   :  { %2041 = vmatpush3.bf16.msra.mxu0 %v2335_v28  ;;  %p2453_p6 = pnand %p2452_p5, %p2446_p2 }
  0x68   :  { %2105 = vmatpush3.bf16.msra.mxu1 %v2336_v29  ;;  %2170 = vmatprep.subr.bf16.mxu0 %v2343_v32 }
  0x69   :  { %1140 = vmatmul.mubr.bf16.gmra.mrb[16].mxu0 %v2301_v2  ;;  %2202 = vmatprep.subr.bf16.mxu1 %v2343_v32  ;;  %v2383_v2 = vld [vmem:[#allocation2 + $0x1c0] ss:$36 sps:$4 sm:$0xff]  }
  0x6a   :  { %1237 = vmatmul.mubr.bf16.gmra.mrb[16].mxu1 %v2302_v4  ;;  %1147 = vmatprep.mubr.bf16.mxu0 %v2307_v8  ;;  %v2386_v4 = vld [vmem:[#allocation2 + $0x20c] ss:$36 sps:$4 sm:$0xff]   ;;  %v2393_v8 = vld [vmem:[#allocation2 + $0x20] ss:$36 sps:$4 sm:$0xff]  }
  0x6b   :  { %1244 = vmatprep.mubr.bf16.mxu1 %v2309_v9  ;;  %v2394_v9 = vld [vmem:[#allocation2 + $0x140] ss:$36 sps:$4 sm:$0xff]  }
  0x71   :  { %1148 = vmatmul.mubr.bf16.gmra.mrb[20].mxu0 %v2311_v12  ;;  %v2397_v12 = vld [vmem:[#allocation2 + $0xb0] ss:$36 sps:$4 sm:$0xff]  }
  0x72   :  { %1245 = vmatmul.mubr.bf16.gmra.mrb[20].mxu1 %v2312_v15  ;;  %1155 = vmatprep.mubr.bf16.mxu0 %v2317_v16  ;;  %v2400_v15 = vld [vmem:[#allocation2 + $0x218] ss:$36 sps:$4 sm:$0xff]  }
  0x73   :  { %1252 = vmatprep.mubr.bf16.mxu1 %v2319_v17 }
  0x79   :  { %1156 = vmatmul.mubr.bf16.gmra.mrb[24].mxu0 %v2321_v22 }
  0x7a   :  { %1253 = vmatmul.mubr.bf16.gmra.mrb[24].mxu1 %v2322_v23  ;;  %1163 = vmatprep.mubr.bf16.mxu0 %v2327_v24 }
  0x7b   :  { %1260 = vmatprep.mubr.bf16.mxu1 %v2329_v25 }
  0x81   :  { %1164 = vmatmul.mubr.bf16.gmra.mrb[28].mxu0 %v2331_v30 }
  0x82   :  { %1261 = vmatmul.mubr.bf16.gmra.mrb[28].mxu1 %v2332_v31  ;;  %1301 = vmatprep.mubr.bf16.mxu0 %v2339_v33 }
  0x83   :  { %1398 = vmatprep.mubr.bf16.mxu1 %v2342_v34 }
  0x89   :  { %1302 = vmatmul.mubr.bf16.vlgmr.msra.gmra.mrb[32].mxu0 %v2337_v35 }
  0x8a   :  { %1399 = vmatmul.mubr.bf16.vlgmr.msra.gmra.mrb[32].mxu1 %v2340_v36  ;;  %2171 = vmatpush3.bf16.msra.mxu0 %v2343_v32 }
  0x8b   :  { %2210 = vmatpush3.bf16.msra.mxu1 %v2343_v32  ;;  %1309 = vmatprep.mubr.bf16.mxu0 %v2344_v37 }
  0x8c   :  { %1406 = vmatprep.mubr.bf16.mxu1 %v2346_v38  ;;  %2172 = vmatprep.subr.bf16.mxu0 %v2350_v39 }
  0x8d   :  { %2203 = vmatprep.subr.bf16.mxu1 %v2350_v39 }
  0x8e   :  { %2173 = vmatpush3.bf16.msra.mxu0 %v2350_v39 }
  0x8f   :  { %2211 = vmatpush3.bf16.msra.mxu1 %v2350_v39  ;;  %2174 = vmatprep.subr.bf16.mxu0 %v2357_v40 }
  0x90   :  { %2204 = vmatprep.subr.bf16.mxu1 %v2357_v40 }
  0x91   :  { %1310 = vmatmul.mubr.bf16.gmra.mrb[36].mxu0 %v2348_v41 }
  0x92   :  { %1407 = vmatmul.mubr.bf16.gmra.mrb[36].mxu1 %v2349_v42  ;;  %1317 = vmatprep.mubr.bf16.mxu0 %v2351_v43 }
  0x93   :  { %1414 = vmatprep.mubr.bf16.mxu1 %v2353_v44  ;;  %2175 = vmatpush3.bf16.msra.mxu0 %v2357_v40 }
  0x94   :  { %2212 = vmatpush3.bf16.msra.mxu1 %v2357_v40  ;;  %2176 = vmatprep.subr.bf16.mxu0 %v2364_v45 }
  0x95   :  { %2205 = vmatprep.subr.bf16.mxu1 %v2364_v45 }
  0x97   :  { %2177 = vmatpush3.bf16.msra.mxu0 %v2364_v45 }
  0x98   :  { %2213 = vmatpush3.bf16.msra.mxu1 %v2364_v45  ;;  %2178 = vmatprep.subr.bf16.mxu0 %v2371_v46 }
  0x99   :  { %1318 = vmatmul.mubr.bf16.gmra.mrb[40].mxu0 %v2355_v47  ;;  %2206 = vmatprep.subr.bf16.mxu1 %v2371_v46 }
  0x9a   :  { %1415 = vmatmul.mubr.bf16.gmra.mrb[40].mxu1 %v2356_v48  ;;  %1325 = vmatprep.mubr.bf16.mxu0 %v2358_v49 }
  0x9b   :  { %1422 = vmatprep.mubr.bf16.mxu1 %v2360_v50  ;;  %2179 = vmatpush3.bf16.msra.mxu0 %v2371_v46 }
  0x9c   :  { %2214 = vmatpush3.bf16.msra.mxu1 %v2371_v46  ;;  %2180 = vmatprep.subr.bf16.mxu0 %v2378_v51 }
  0x9d   :  { %2207 = vmatprep.subr.bf16.mxu1 %v2378_v51 }
  0x9f   :  { %2181 = vmatpush3.bf16.msra.mxu0 %v2378_v51 }
  0xa0   :  { %2215 = vmatpush3.bf16.msra.mxu1 %v2378_v51  ;;  %2182 = vmatprep.subr.bf16.mxu0 %v2385_v53 }
  0xa1   :  { %1326 = vmatmul.mubr.bf16.gmra.mrb[44].mxu0 %v2362_v52  ;;  %2208 = vmatprep.subr.bf16.mxu1 %v2385_v53 }
  0xa2   :  { %1423 = vmatmul.mubr.bf16.gmra.mrb[44].mxu1 %v2363_v54  ;;  %1333 = vmatprep.mubr.bf16.mxu0 %v2365_v55 }
  0xa3   :  { %1430 = vmatprep.mubr.bf16.mxu1 %v2367_v56  ;;  %2183 = vmatpush3.bf16.msra.mxu0 %v2385_v53 }
  0xa4   :  { %2216 = vmatpush3.bf16.msra.mxu1 %v2385_v53  ;;  %2184 = vmatprep.subr.bf16.mxu0 %v2392_v57 }
  0xa5   :  { %2209 = vmatprep.subr.bf16.mxu1 %v2392_v57 }
  0xa7   :  { %2185 = vmatpush3.bf16.msra.mxu0 %v2392_v57 }
  0xa8   :  { %2217 = vmatpush3.bf16.msra.mxu1 %v2392_v57 }
  0xa9   :  { %1334 = vmatmul.mubr.bf16.gmra.mrb[48].mxu0 %v2369_v58 }
  0xaa   :  { %1431 = vmatmul.mubr.bf16.gmra.mrb[48].mxu1 %v2370_v59  ;;  %1341 = vmatprep.mubr.bf16.mxu0 %v2372_v60 }
  0xab   :  { %1438 = vmatprep.mubr.bf16.mxu1 %v2374_v61 }
  0xb1   :  { %1342 = vmatmul.mubr.bf16.gmra.mrb[52].mxu0 %v2376_v62 }
  0xb2   :  { %1439 = vmatmul.mubr.bf16.gmra.mrb[52].mxu1 %v2377_v63  ;;  %1349 = vmatprep.mubr.bf16.mxu0 %v2379_v0 }
  0xb3   :  { %1446 = vmatprep.mubr.bf16.mxu1 %v2381_v1 }
  0xb9   :  { %1350 = vmatmul.mubr.bf16.gmra.mrb[56].mxu0 %v2383_v2 }
  0xba   :  { %1447 = vmatmul.mubr.bf16.gmra.mrb[56].mxu1 %v2384_v3  ;;  %1357 = vmatprep.mubr.bf16.mxu0 %v2386_v4 }
  0xbb   :  { %1454 = vmatprep.mubr.bf16.mxu1 %v2388_v5 }
  0xc1   :  { %1358 = vmatmul.mubr.bf16.gmra.mrb[60].mxu0 %v2390_v6 }
  0xc2   :  { %1455 = vmatmul.mubr.bf16.gmra.mrb[60].mxu1 %v2391_v7  ;;  %2186 = vmatprep.mubr.bf16.mxu0 %v2393_v8 }
  0xc3   :  { %2194 = vmatprep.mubr.bf16.mxu1 %v2394_v9 }
  0xc9   :  { %2187 = vmatmul.mubr.bf16.vlgmr.msra.gmra.mrb[64].mxu0 %v2395_v10 }
  0xca   :  { %2195 = vmatmul.mubr.bf16.vlgmr.msra.gmra.mrb[64].mxu1 %v2396_v11  ;;  %2190 = vmatprep.mubr.bf16.mxu0 %v2397_v12 }
  0xcb   :  { %2198 = vmatprep.mubr.bf16.mxu1 %v2398_v13 }
  0xd1   :  { %2191 = vmatmul.mubr.bf16.gmra.mrb[68].mxu0 %v2399_v14 }
  0xd2   :  { %2199 = vmatmul.mubr.bf16.gmra.mrb[68].mxu1 %v2400_v15 }
 0x11c   :  { %v1914_v16 = vpop.f32.mrb[0].mxu0 }
 0x11d   :  { %v1978_v17 = vpop.f32.mrb[0].mxu1  ;;  %v1915_v19 = vpop.f32.mrb[1].mxu0 }
 0x11e   :  { %v1916_v20 = vadd.f32 %v1915_v19, %v1914_v16  ;;  %v1979_v21 = vpop.f32.mrb[1].mxu1  ;;  %v1917_v22 = vpop.f32.mrb[2].mxu0 }
 0x11f   :  { %v1980_v23 = vadd.f32 %v1979_v21, %v1978_v17  ;;  %v1981_v24 = vpop.f32.mrb[2].mxu1  ;;  %v1918_v25 = vpop.f32.mrb[3].mxu0 }
 0x120   :  { %v1110_v26 = vadd.f32 %v1916_v20, %v2530_v18  ;;  %v1919_v27 = vadd.f32 %v1918_v25, %v1917_v22  ;;  %v1982_v28 = vpop.f32.mrb[3].mxu1 }
 0x121   :  { %v1983_v29 = vadd.f32 %v1982_v28, %v1981_v24 }
 0x122   :  { %v2533_v30 = vadd.f32 %v1980_v23, %v1110_v26  ;;  %v1113_v31 = vadd.f32 %v1919_v27, %v2530_v18 }
 0x124   :  { %v2536_v32 = vadd.f32 %v1983_v29, %v1113_v31  ;;  %v1920_v33 = vpop.f32.mrb[4].mxu0 }
 0x125   :  { %v1984_v34 = vpop.f32.mrb[4].mxu1  ;;  %v1921_v35 = vpop.f32.mrb[5].mxu0 }
 0x126   :  { %v1922_v36 = vadd.f32 %v1921_v35, %v1920_v33  ;;  %v1985_v37 = vpop.f32.mrb[5].mxu1  ;;  %v1923_v38 = vpop.f32.mrb[6].mxu0 }
 0x127   :  { %v1986_v39 = vadd.f32 %v1985_v37, %v1984_v34  ;;  %v1987_v40 = vpop.f32.mrb[6].mxu1  ;;  %v1924_v41 = vpop.f32.mrb[7].mxu0 }
 0x128   :  { %v1118_v42 = vadd.f32 %v1922_v36, %v2530_v18  ;;  %v1925_v43 = vadd.f32 %v1924_v41, %v1923_v38  ;;  %v1988_v44 = vpop.f32.mrb[7].mxu1 }
 0x129   :  { %v1989_v45 = vadd.f32 %v1988_v44, %v1987_v40 }
 0x12a   :  { %v2539_v46 = vadd.f32 %v1986_v39, %v1118_v42  ;;  %v1121_v47 = vadd.f32 %v1925_v43, %v2530_v18 }
 0x12c   :  { %v2542_v48 = vadd.f32 %v1989_v45, %v1121_v47  ;;  %v1926_v49 = vpop.f32.mrb[8].mxu0 }
 0x12d   :  { %v1990_v50 = vpop.f32.mrb[8].mxu1  ;;  %v1927_v51 = vpop.f32.mrb[9].mxu0 }
 0x12e   :  { %v1928_v52 = vadd.f32 %v1927_v51, %v1926_v49  ;;  %v1991_v53 = vpop.f32.mrb[9].mxu1  ;;  %v1929_v54 = vpop.f32.mrb[10].mxu0 }
 0x12f   :  { %v1992_v55 = vadd.f32 %v1991_v53, %v1990_v50  ;;  %v1993_v56 = vpop.f32.mrb[10].mxu1  ;;  %v1930_v57 = vpop.f32.mrb[11].mxu0 }
 0x130   :  { %v1126_v58 = vadd.f32 %v1928_v52, %v2530_v18  ;;  %v1931_v59 = vadd.f32 %v1930_v57, %v1929_v54  ;;  %v1994_v60 = vpop.f32.mrb[11].mxu1 }
 0x131   :  { %v1995_v61 = vadd.f32 %v1994_v60, %v1993_v56 }
 0x132   :  { %v2545_v62 = vadd.f32 %v1992_v55, %v1126_v58  ;;  %v1129_v63 = vadd.f32 %v1931_v59, %v2530_v18 }
 0x134   :  { %v2548_v0 = vadd.f32 %v1995_v61, %v1129_v63  ;;  %v1932_v1 = vpop.f32.mrb[12].mxu0 }
 0x135   :  { %v1996_v2 = vpop.f32.mrb[12].mxu1  ;;  %v1933_v3 = vpop.f32.mrb[13].mxu0 }
 0x136   :  { %v1934_v4 = vadd.f32 %v1933_v3, %v1932_v1  ;;  %v1997_v5 = vpop.f32.mrb[13].mxu1  ;;  %v1935_v6 = vpop.f32.mrb[14].mxu0 }
 0x137   :  { %v1998_v7 = vadd.f32 %v1997_v5, %v1996_v2  ;;  %v1999_v8 = vpop.f32.mrb[14].mxu1  ;;  %v1936_v9 = vpop.f32.mrb[15].mxu0 }
 0x138   :  { %v1134_v10 = vadd.f32 %v1934_v4, %v2530_v18  ;;  %v1937_v11 = vadd.f32 %v1936_v9, %v1935_v6  ;;  %v2000_v12 = vpop.f32.mrb[15].mxu1 }
 0x139   :  { %v2001_v13 = vadd.f32 %v2000_v12, %v1999_v8 }
 0x13a   :  { %v2551_v14 = vadd.f32 %v1998_v7, %v1134_v10  ;;  %v1137_v15 = vadd.f32 %v1937_v11, %v2530_v18 }
 0x13c   :  { %v2554_v16 = vadd.f32 %v2001_v13, %v1137_v15  ;;  %v1938_v17 = vpop.f32.mrb[16].mxu0 }
 0x13d   :  { %v2002_v19 = vpop.f32.mrb[16].mxu1  ;;  %v1939_v20 = vpop.f32.mrb[17].mxu0 }
 0x13e   :  { %v1940_v21 = vadd.f32 %v1939_v20, %v1938_v17  ;;  %v2003_v22 = vpop.f32.mrb[17].mxu1  ;;  %v1941_v23 = vpop.f32.mrb[18].mxu0 }
 0x13f   :  { %v2004_v24 = vadd.f32 %v2003_v22, %v2002_v19  ;;  %v2005_v25 = vpop.f32.mrb[18].mxu1  ;;  %v1942_v26 = vpop.f32.mrb[19].mxu0 }
 0x140   :  { %v1142_v27 = vadd.f32 %v1940_v21, %v2530_v18  ;;  %v1943_v28 = vadd.f32 %v1942_v26, %v1941_v23  ;;  %v2006_v29 = vpop.f32.mrb[19].mxu1 }
 0x141   :  { %v2007_v31 = vadd.f32 %v2006_v29, %v2005_v25 }
 0x142   :  { %v2557_v33 = vadd.f32 %v2004_v24, %v1142_v27  ;;  %v1145_v34 = vadd.f32 %v1943_v28, %v2530_v18 }
 0x144   :  { %v2560_v35 = vadd.f32 %v2007_v31, %v1145_v34  ;;  %v1944_v36 = vpop.f32.mrb[20].mxu0 }
 0x145   :  { %v2008_v37 = vpop.f32.mrb[20].mxu1  ;;  %v1945_v38 = vpop.f32.mrb[21].mxu0 }
 0x146   :  { %v1946_v39 = vadd.f32 %v1945_v38, %v1944_v36  ;;  %v2009_v40 = vpop.f32.mrb[21].mxu1  ;;  %v1947_v41 = vpop.f32.mrb[22].mxu0 }
 0x147   :  { %v2010_v42 = vadd.f32 %v2009_v40, %v2008_v37  ;;  %v2011_v43 = vpop.f32.mrb[22].mxu1  ;;  %v1948_v44 = vpop.f32.mrb[23].mxu0 }
 0x148   :  { %v1150_v45 = vadd.f32 %v1946_v39, %v2530_v18  ;;  %v1949_v47 = vadd.f32 %v1948_v44, %v1947_v41  ;;  %v2012_v49 = vpop.f32.mrb[23].mxu1 }
 0x149   :  { %v2013_v50 = vadd.f32 %v2012_v49, %v2011_v43 }
 0x14a   :  { %v2563_v51 = vadd.f32 %v2010_v42, %v1150_v45  ;;  %v1153_v52 = vadd.f32 %v1949_v47, %v2530_v18 }
 0x14c   :  { %v2566_v53 = vadd.f32 %v2013_v50, %v1153_v52  ;;  %v1950_v54 = vpop.f32.mrb[24].mxu0 }
 0x14d   :  { %v2014_v55 = vpop.f32.mrb[24].mxu1  ;;  %v1951_v56 = vpop.f32.mrb[25].mxu0 }
 0x14e   :  { %v1952_v57 = vadd.f32 %v1951_v56, %v1950_v54  ;;  %v2015_v58 = vpop.f32.mrb[25].mxu1  ;;  %v1953_v59 = vpop.f32.mrb[26].mxu0 }
 0x14f   :  { %v2016_v60 = vadd.f32 %v2015_v58, %v2014_v55  ;;  %v2017_v61 = vpop.f32.mrb[26].mxu1  ;;  %v1954_v63 = vpop.f32.mrb[27].mxu0 }
 0x150   :  { %v1158_v1 = vadd.f32 %v1952_v57, %v2530_v18  ;;  %v1955_v2 = vadd.f32 %v1954_v63, %v1953_v59  ;;  %v2018_v3 = vpop.f32.mrb[27].mxu1 }
 0x151   :  { %v2019_v4 = vadd.f32 %v2018_v3, %v2017_v61 }
 0x152   :  { %v2569_v5 = vadd.f32 %v2016_v60, %v1158_v1  ;;  %v1161_v6 = vadd.f32 %v1955_v2, %v2530_v18 }
 0x154   :  { %v2572_v7 = vadd.f32 %v2019_v4, %v1161_v6  ;;  %v1956_v8 = vpop.f32.mrb[28].mxu0 }
 0x155   :  { %v2020_v9 = vpop.f32.mrb[28].mxu1  ;;  %v1957_v10 = vpop.f32.mrb[29].mxu0 }
 0x156   :  { %v1958_v11 = vadd.f32 %v1957_v10, %v1956_v8  ;;  %v2021_v12 = vpop.f32.mrb[29].mxu1  ;;  %v1959_v13 = vpop.f32.mrb[30].mxu0 }
 0x157   :  { %v2022_v15 = vadd.f32 %v2021_v12, %v2020_v9  ;;  %v2023_v17 = vpop.f32.mrb[30].mxu1  ;;  %v1960_v19 = vpop.f32.mrb[31].mxu0 }
 0x158   :  { %v1166_v20 = vadd.f32 %v1958_v11, %v2530_v18  ;;  %v1961_v21 = vadd.f32 %v1960_v19, %v1959_v13  ;;  %v2024_v22 = vpop.f32.mrb[31].mxu1 }
 0x159   :  { %v2025_v23 = vadd.f32 %v2024_v22, %v2023_v17 }
 0x15a   :  { %v2575_v24 = vadd.f32 %v2022_v15, %v1166_v20  ;;  %v1169_v25 = vadd.f32 %v1961_v21, %v2530_v18 }
 0x15c   :  { %v2578_v26 = vadd.f32 %v2025_v23, %v1169_v25  ;;  %v2042_v27 = vpop.f32.mrb[32].mxu0 }
 0x15d   :  { %v2106_v28 = vpop.f32.mrb[32].mxu1  ;;  %v2043_v29 = vpop.f32.mrb[33].mxu0 }
 0x15e   :  { %v2044_v31 = vadd.f32 %v2043_v29, %v2042_v27  ;;  %v2107_v34 = vpop.f32.mrb[33].mxu1  ;;  %v2045_v36 = vpop.f32.mrb[34].mxu0 }
 0x15f   :  { %v2108_v37 = vadd.f32 %v2107_v34, %v2106_v28  ;;  %v2109_v38 = vpop.f32.mrb[34].mxu1  ;;  %v2046_v39 = vpop.f32.mrb[35].mxu0 }
 0x160   :  { %v1304_v40 = vadd.f32 %v2044_v31, %v2533_v30  ;;  %v2047_v41 = vadd.f32 %v2046_v39, %v2045_v36  ;;  %v2110_v42 = vpop.f32.mrb[35].mxu1 }
 0x161   :  { %v2111_v43 = vadd.f32 %v2110_v42, %v2109_v38 }
 0x162   :  { %v1307_v44 = vadd.f32 %v2047_v41, %v2536_v32  ;;  %v2582_v45 = vadd.f32 %v2108_v37, %v1304_v40 }
 0x164   :  { %v2048_v18 = vpop.f32.mrb[36].mxu0  ;;  %v2584_v47 = vadd.f32 %v2111_v43, %v1307_v44 }
 0x165   :  { %v2112_v49 = vpop.f32.mrb[36].mxu1  ;;  %v2049_v50 = vpop.f32.mrb[37].mxu0 }
 0x166   :  { %v2050_v52 = vadd.f32 %v2049_v50, %v2048_v18  ;;  %v2113_v54 = vpop.f32.mrb[37].mxu1  ;;  %v2051_v55 = vpop.f32.mrb[38].mxu0 }
 0x167   :  { %v2114_v56 = vadd.f32 %v2113_v54, %v2112_v49  ;;  %v2115_v57 = vpop.f32.mrb[38].mxu1  ;;  %v2052_v58 = vpop.f32.mrb[39].mxu0 }
 0x168   :  { %v1312_v30 = vadd.f32 %v2050_v52, %v2539_v46  ;;  %v2053_v59 = vadd.f32 %v2052_v58, %v2051_v55  ;;  %v2116_v60 = vpop.f32.mrb[39].mxu1 }
 0x169   :  { %v2117_v61 = vadd.f32 %v2116_v60, %v2115_v57 }
 0x16a   :  { %v1315_v32 = vadd.f32 %v2053_v59, %v2542_v48  ;;  %v2588_v63 = vadd.f32 %v2114_v56, %v1312_v30 }
 0x16c   :  { %v2054_v1 = vpop.f32.mrb[40].mxu0  ;;  %v2590_v2 = vadd.f32 %v2117_v61, %v1315_v32 }
 0x16d   :  { %v2118_v3 = vpop.f32.mrb[40].mxu1  ;;  %v2055_v4 = vpop.f32.mrb[41].mxu0 }
 0x16e   :  { %v2056_v6 = vadd.f32 %v2055_v4, %v2054_v1  ;;  %v2119_v8 = vpop.f32.mrb[41].mxu1  ;;  %v2057_v9 = vpop.f32.mrb[42].mxu0 }
 0x16f   :  { %v2120_v10 = vadd.f32 %v2119_v8, %v2118_v3  ;;  %v2121_v11 = vpop.f32.mrb[42].mxu1  ;;  %v2058_v12 = vpop.f32.mrb[43].mxu0 }
 0x170   :  { %v1320_v46 = vadd.f32 %v2056_v6, %v2545_v62  ;;  %v2059_v13 = vadd.f32 %v2058_v12, %v2057_v9  ;;  %v2122_v15 = vpop.f32.mrb[43].mxu1 }
 0x171   :  { %v2123_v17 = vadd.f32 %v2122_v15, %v2121_v11 }
 0x172   :  { %v1323_v48 = vadd.f32 %v2059_v13, %v2548_v0  ;;  %v2594_v19 = vadd.f32 %v2120_v10, %v1320_v46 }
 0x174   :  { %v2060_v20 = vpop.f32.mrb[44].mxu0  ;;  %v2596_v21 = vadd.f32 %v2123_v17, %v1323_v48 }
 0x175   :  { %v2124_v22 = vpop.f32.mrb[44].mxu1  ;;  %v2061_v23 = vpop.f32.mrb[45].mxu0 }
 0x176   :  { %v2062_v25 = vadd.f32 %v2061_v23, %v2060_v20  ;;  %v2125_v27 = vpop.f32.mrb[45].mxu1  ;;  %v2063_v28 = vpop.f32.mrb[46].mxu0 }
 0x177   :  { %v2126_v29 = vadd.f32 %v2125_v27, %v2124_v22  ;;  %v2127_v31 = vpop.f32.mrb[46].mxu1  ;;  %v2064_v34 = vpop.f32.mrb[47].mxu0 }
 0x178   :  { %v1328_v62 = vadd.f32 %v2062_v25, %v2551_v14  ;;  %v2065_v36 = vadd.f32 %v2064_v34, %v2063_v28  ;;  %v2128_v37 = vpop.f32.mrb[47].mxu1 }
 0x179   :  { %v2129_v38 = vadd.f32 %v2128_v37, %v2127_v31 }
 0x17a   :  { %v1331_v0 = vadd.f32 %v2065_v36, %v2554_v16  ;;  %v2600_v39 = vadd.f32 %v2126_v29, %v1328_v62 }
 0x17c   :  { %v2066_v40 = vpop.f32.mrb[48].mxu0  ;;  %v2602_v41 = vadd.f32 %v2129_v38, %v1331_v0 }
 0x17d   :  { %v2130_v42 = vpop.f32.mrb[48].mxu1  ;;  %v2067_v43 = vpop.f32.mrb[49].mxu0 }
 0x17e   :  { %v2068_v44 = vadd.f32 %v2067_v43, %v2066_v40  ;;  %v2131_v18 = vpop.f32.mrb[49].mxu1  ;;  %v2069_v49 = vpop.f32.mrb[50].mxu0 }
 0x17f   :  { %v2132_v50 = vadd.f32 %v2131_v18, %v2130_v42  ;;  %v2133_v52 = vpop.f32.mrb[50].mxu1  ;;  %v2070_v54 = vpop.f32.mrb[51].mxu0 }
 0x180   :  { %v1336_v14 = vadd.f32 %v2068_v44, %v2557_v33  ;;  %v2071_v55 = vadd.f32 %v2070_v54, %v2069_v49  ;;  %v2134_v56 = vpop.f32.mrb[51].mxu1 }
 0x181   :  { %v2135_v57 = vadd.f32 %v2134_v56, %v2133_v52 }
 0x182   :  { %v1339_v16 = vadd.f32 %v2071_v55, %v2560_v35  ;;  %v1433_v58 = vadd.f32 %v2132_v50, %v1336_v14 }
 0x184   :  { %v2072_v30 = vpop.f32.mrb[52].mxu0  ;;  %v2606_v59 = vadd.f32 %v2135_v57, %v1339_v16 }
 0x185   :  { %v2136_v60 = vpop.f32.mrb[52].mxu1  ;;  %v2073_v61 = vpop.f32.mrb[53].mxu0 }
 0x186   :  { %v2074_v32 = vadd.f32 %v2073_v61, %v2072_v30  ;;  %v2137_v1 = vpop.f32.mrb[53].mxu1  ;;  %v2075_v3 = vpop.f32.mrb[54].mxu0 }
 0x187   :  { %v2138_v4 = vadd.f32 %v2137_v1, %v2136_v60  ;;  %v2139_v6 = vpop.f32.mrb[54].mxu1  ;;  %v2076_v8 = vpop.f32.mrb[55].mxu0 }
 0x188   :  { %v1344_v9 = vadd.f32 %v2074_v32, %v2563_v51  ;;  %v2077_v33 = vadd.f32 %v2076_v8, %v2075_v3  ;;  %v2140_v10 = vpop.f32.mrb[55].mxu1 }
 0x189   :  { %v2141_v11 = vadd.f32 %v2140_v10, %v2139_v6 }
 0x18a   :  { %v1347_v12 = vadd.f32 %v2077_v33, %v2566_v53  ;;  %v1441_v35 = vadd.f32 %v2138_v4, %v1344_v9 }
 0x18c   :  { %v2078_v46 = vpop.f32.mrb[56].mxu0  ;;  %v1444_v13 = vadd.f32 %v2141_v11, %v1347_v12 }
 0x18d   :  { %v2142_v15 = vpop.f32.mrb[56].mxu1  ;;  %v2079_v17 = vpop.f32.mrb[57].mxu0 }
 0x18e   :  { %v2080_v48 = vadd.f32 %v2079_v17, %v2078_v46  ;;  %v2143_v20 = vpop.f32.mrb[57].mxu1  ;;  %v2081_v22 = vpop.f32.mrb[58].mxu0 }
 0x18f   :  { %v2144_v23 = vadd.f32 %v2143_v20, %v2142_v15  ;;  %v2145_v25 = vpop.f32.mrb[58].mxu1  ;;  %v2082_v27 = vpop.f32.mrb[59].mxu0 }
 0x190   :  { %v1352_v28 = vadd.f32 %v2080_v48, %v2569_v5  ;;  %v2083_v29 = vadd.f32 %v2082_v27, %v2081_v22  ;;  %v2146_v51 = vpop.f32.mrb[59].mxu1 }
 0x191   :  { %v2147_v31 = vadd.f32 %v2146_v51, %v2145_v25 }
 0x192   :  { %v1355_v34 = vadd.f32 %v2083_v29, %v2572_v7  ;;  %v1449_v62 = vadd.f32 %v2144_v23, %v1352_v28 }
 0x194   :  { %v2084_v53 = vpop.f32.mrb[60].mxu0  ;;  %v2612_v36 = vadd.f32 %v2147_v31, %v1355_v34 }
 0x195   :  { %v2148_v37 = vpop.f32.mrb[60].mxu1  ;;  %v2085_v38 = vpop.f32.mrb[61].mxu0 }
 0x196   :  { %v2086_v0 = vadd.f32 %v2085_v38, %v2084_v53  ;;  %v2149_v40 = vpop.f32.mrb[61].mxu1  ;;  %v2087_v42 = vpop.f32.mrb[62].mxu0 }
 0x197   :  { %v2150_v43 = vadd.f32 %v2149_v40, %v2148_v37  ;;  %v2151_v44 = vpop.f32.mrb[62].mxu1  ;;  %v2088_v18 = vpop.f32.mrb[63].mxu0 }
 0x198   :  { %v1360_v49 = vadd.f32 %v2086_v0, %v2575_v24  ;;  %v2089_v5 = vadd.f32 %v2088_v18, %v2087_v42  ;;  %v2152_v50 = vpop.f32.mrb[63].mxu1 }
 0x199   :  { %v2153_v52 = vadd.f32 %v2152_v50, %v2151_v44 }
 0x19a   :  { %v1363_v54 = vadd.f32 %v2089_v5, %v2578_v26  ;;  %v1457_v7 = vadd.f32 %v2150_v43, %v1360_v49 }
 0x19c   :  { %v2188_v14 = vpop.f32.mrb[64].mxu0  ;;  %v1460_v55 = vadd.f32 %v2153_v52, %v1363_v54 }
 0x19d   :  { %v1506_v56 = vadd.f32 %v2188_v14, %v2588_v63  ;;  %v2196_v57 = vpop.f32.mrb[64].mxu1  ;;  %v1497_v16 = vpop.f32.mrb[65].mxu0 }
 0x19e   :  { %v1538_v30 = vadd.f32 %v2196_v57, %v1441_v35  ;;  %v1498_v60 = vadd.f32 %v1497_v16, %v2582_v45  ;;  %v1529_v61 = vpop.f32.mrb[65].mxu1  ;;  %v2189_v32 = vpop.f32.mrb[66].mxu0 }
 0x19f   :  { %v1530_v1 = vadd.f32 %v1529_v61, %v1433_v58  ;;  %v1509_v24 = vadd.f32 %v2189_v32, %v2590_v2  ;;  %v2197_v3 = vpop.f32.mrb[66].mxu1  ;;  %v1500_v4 = vpop.f32.mrb[67].mxu0  ;;  %v1562_v9 = vmax.f32 %v1506_v56, 0.0 }
 0x1a0   :  { %v1541_v6 = vadd.f32 %v2197_v3, %v1444_v13  ;;  %v1501_v26 = vadd.f32 %v1500_v4, %v2584_v47  ;;  %v1532_v8 = vpop.f32.mrb[67].mxu1  ;;  %v1570_v10 = vmax.f32 %v1538_v30, 0.0  ;;  %v1560_v11 = vmax.f32 %v1498_v60, 0.0 }
 0x1a1   :  { %v1563_v33 = vmax.f32 %v1509_v24, 0.0  ;;  %v1533_v63 = vadd.f32 %v1532_v8, %v2606_v59  ;;  %v1568_v45 = vmax.f32 %v1530_v1, 0.0 }
 0x1a2   :  { %v1571_v12 = vmax.f32 %v1541_v6, 0.0  ;;  %v1561_v35 = vmax.f32 %v1501_v26, 0.0 }
 0x1a3   :  { %v1859_v46 = vpack.c.bf16 %v1563_v33, %v1562_v9  ;;  %v1569_v15 = vmax.f32 %v1533_v63, 0.0 }
 0x1a4   :  { %v1879_v58 = vpack.c.bf16 %v1571_v12, %v1570_v10  ;;  %v1854_v17 = vpack.c.bf16 %v1561_v35, %v1560_v11  ;;  %v2192_v2 = vpop.f32.mrb[68].mxu0 }
 0x1a5   :  { %1891 = vst [vmem:[#allocation7 + $0x8] sm:$0xff] %v1859_v46   ;;  %v1874_v48 = vpack.c.bf16 %v1569_v15, %v1568_v45  ;;  %v1522_v13 = vadd.f32 %v2192_v2, %v2600_v39  ;;  %v2200_v47 = vpop.f32.mrb[68].mxu1  ;;  %v1513_v20 = vpop.f32.mrb[69].mxu0 }
 0x1a6   :  { %1895 = vst [vmem:[#allocation7 + $0x28] sm:$0xff] %v1879_v58   ;;  %1855 = vst [vmem:[#allocation7] sm:$0xff] %v1854_v17   ;;  %v1554_v22 = vadd.f32 %v2200_v47, %v1457_v7  ;;  %v1514_v59 = vadd.f32 %v1513_v20, %v2594_v19  ;;  %v1545_v23 = vpop.f32.mrb[69].mxu1  ;;  %v2193_v25 = vpop.f32.mrb[70].mxu0 }
 0x1a7   :  { %1894 = vst [vmem:[#allocation7 + $0x20] sm:$0xff] %v1874_v48   ;;  %v1546_v27 = vadd.f32 %v1545_v23, %v1449_v62  ;;  %v1525_v28 = vadd.f32 %v2193_v25, %v2602_v41  ;;  %v2201_v29 = vpop.f32.mrb[70].mxu1  ;;  %v1516_v51 = vpop.f32.mrb[71].mxu0  ;;  %v1566_v39 = vmax.f32 %v1522_v13, 0.0 }
 0x1a8   :  { %v1557_v31 = vadd.f32 %v2201_v29, %v1460_v55  ;;  %v1517_v34 = vadd.f32 %v1516_v51, %v2596_v21  ;;  %v1548_v53 = vpop.f32.mrb[71].mxu1  ;;  %v1574_v0 = vmax.f32 %v1554_v22, 0.0  ;;  %v1564_v40 = vmax.f32 %v1514_v59, 0.0 }
 0x1a9   :  { %v1567_v37 = vmax.f32 %v1525_v28, 0.0  ;;  %v1549_v38 = vadd.f32 %v1548_v53, %v2612_v36  ;;  %v1572_v43 = vmax.f32 %v1546_v27, 0.0 }
 0x1aa   :  { %v1575_v42 = vmax.f32 %v1557_v31, 0.0  ;;  %v1565_v19 = vmax.f32 %v1517_v34, 0.0 }
 0x1ab   :  { %v1869_v62 = vpack.c.bf16 %v1567_v37, %v1566_v39  ;;  %v1573_v44 = vmax.f32 %v1549_v38, 0.0 }
 0x1ac   :  { %v1889_v41 = vpack.c.bf16 %v1575_v42, %v1574_v0  ;;  %v1864_v18 = vpack.c.bf16 %v1565_v19, %v1564_v40 }
 0x1ad   :  { %1893 = vst [vmem:[#allocation7 + $0x18] sm:$0xff] %v1869_v62   ;;  %v1884_v49 = vpack.c.bf16 %v1573_v44, %v1572_v43 }
 0x1ae   :  { %1897 = vst [vmem:[#allocation7 + $0x38] sm:$0xff] %v1889_v41   ;;  %1892 = vst [vmem:[#allocation7 + $0x10] sm:$0xff] %v1864_v18  }
 0x1af   :  { %1896 = vst [vmem:[#allocation7 + $0x30] sm:$0xff] %v1884_v49  }
 0x1b0   :  { %2456 = shalt.err (!%p2453_p6)
}
 0x1b1   :  { %s2457_s17 = scalar_lea.hbm %s2644_s3, 1024 }
 0x1b2   :  { %p2458_p7 = scmp.ne.s32.totalorder %s2644_s3, %s2457_s17  ;;  %p2461_p8 = scmp.lt.u32.totalorder %s2457_s17, %s2644_s3 }
 0x1b4   :  { %p2463_p9 = pnand %p2461_p8, %p2458_p7 }
 0x1b6   :  { %2466 = shalt.err (!%p2463_p9)
}
 0x1b7   :  { %1667 = dma.vmem_to_hbm [thread:$0]  %s1662_s13, 1024, %s2644_s3, [#allocation4], %s2477_s0, %s2477_s0, %s2478_s9  }
 0x1b8   :  { %2471 = dma.done.wait [#allocation4], 1024  }
 0x1b9   :  { %2472 = vsyncadd [#allocation4], 4294966272 }
 0x1ba   :  { %1671 = vsyncpa [#allocation3], 1 }
 0x1bb   :  { %1672 = vsyncpa [#allocation6], 1 }
 0x1bc   :  { %1673 = vsyncpa [#allocation4], 1 }

</bundles_post_ra>
